<compile_context>
chip_gen: v7x
topology: tpu7x:2x2x1
jax: 0.10.0
libtpu: 0.0.40
codegen_flags: <defaults>
</compile_context>

<pallas_src>
import functools
import math

import jax
import jax.numpy as jnp
from jax import lax
from jax.experimental import pallas as pl
from jax.experimental.pallas import tpu as pltpu


# ----------------------------------------------------------------------------
# Hardware-aware tiling defaults
# ----------------------------------------------------------------------------
def _vmem_capacity_bytes():
    try:
        return int(pltpu.get_tpu_info().vmem_capacity_bytes)
    except Exception:
        return 64 * 1024 * 1024            # conservative (v7x-sized) fallback


_VMEM_CAP = _vmem_capacity_bytes()
_SMALL_VMEM = _VMEM_CAP < 96 * 1024 * 1024   # v7x: 64 MiB per TensorCore
_DEF_TM = 128 if _SMALL_VMEM else 256        # row (sublane) tile
_DEF_TN = 256 if _SMALL_VMEM else 512        # lane / output tile
_DEF_TK = 256 if _SMALL_VMEM else 512        # contraction tile
_DEF_TQ = 128 if _SMALL_VMEM else 256        # attention q tile
_DEF_TKV = 128 if _SMALL_VMEM else 256       # attention kv tile
# Explicit scoped-VMEM limit: v5e default is only 16 MiB, v6e/v7x 32 MiB.
_VMEM_LIMIT = int(min(_VMEM_CAP * 3 // 4, 96 * 1024 * 1024))


def _pick_tile(dim, preferred, aligns):
    """Largest tile <= preferred that divides dim and is a multiple of one of
    `aligns` (tried in order, e.g. 256 first for the 256-wide MXU); falls back
    to the full dim (always a legal block)."""
    if dim <= preferred:
        return dim
    for a in aligns:
        if dim % a == 0:
            t = (preferred // a) * a
            while t >= a:
                if dim % t == 0:
                    return t
                t -= a
    return dim


# ----------------------------------------------------------------------------
# Pallas kernels
# ----------------------------------------------------------------------------
def matmul_bias_kernel(x_ref, w_ref, b_ref, o_ref, acc_ref):
    # o = x @ w + b; bf16 operands, K-tiled f32 accumulator.
    k = pl.program_id(2)

    @pl.when(k == 0)
    def _():
        acc_ref[...] = jnp.zeros_like(acc_ref)

    acc_ref[...] += jnp.dot(x_ref[...], w_ref[...],
                            preferred_element_type=jnp.float32)

    @pl.when(k == pl.num_programs(2) - 1)
    def _():
        o_ref[...] = (acc_ref[...] + b_ref[...]).astype(o_ref.dtype)


def matmul_res_ln_kernel(x_ref, w_ref, b_ref, r_ref, g_ref, be_ref, o_ref, acc_ref):
    # o = LayerNorm((x @ w + b) + r)   (eps=1e-5, matching nn.LayerNorm)
    # x/w in bf16, accumulation / residual / LN math in f32.
    k = pl.program_id(1)

    @pl.when(k == 0)
    def _():
        acc_ref[...] = jnp.zeros_like(acc_ref)

    acc_ref[...] += jnp.dot(x_ref[...], w_ref[...],
                            preferred_element_type=jnp.float32)

    @pl.when(k == pl.num_programs(1) - 1)
    def _():
        h = acc_ref[...] + b_ref[...] + r_ref[...]
        mu = jnp.mean(h, axis=-1, keepdims=True)
        var = jnp.mean((h - mu) ** 2, axis=-1, keepdims=True)
        hhat = (h - mu) * lax.rsqrt(var + 1e-5)
        o_ref[...] = (hhat * g_ref[...] + be_ref[...]).astype(o_ref.dtype)


def flash_attn_kernel(q_ref, k_ref, v_ref, o_ref, m_sc, l_sc, acc_sc, *,
                      scale, causal, blk_q, blk_k):
    # Grid = (batch*head, q_tiles, kv_tiles).  One (blk_q, dh) x (blk_k, dh)
    # online-softmax step per invocation; lane-dense (blk_q, dh) store.
    qi = pl.program_id(1)
    ki = pl.program_id(2)

    @pl.when(ki == 0)
    def _():
        m_sc[...] = jnp.full(m_sc.shape, -jnp.inf, dtype=m_sc.dtype)
        l_sc[...] = jnp.zeros_like(l_sc)
        acc_sc[...] = jnp.zeros_like(acc_sc)

    def compute():
        q = q_ref[0]                                     # (blk_q, dh) bf16
        k = k_ref[0]                                     # (blk_k, dh) bf16
        v = v_ref[0]
        s = lax.dot_general(q, k, (((1,), (1,)), ((), ())),
                            preferred_element_type=jnp.float32) * scale
        if causal:
            row = qi * blk_q + lax.broadcasted_iota(jnp.int32, s.shape, 0)
            col = ki * blk_k + lax.broadcasted_iota(jnp.int32, s.shape, 1)
            s = jnp.where(col <= row, s, jnp.finfo(jnp.float32).min)
        m_prev = m_sc[...]
        m_new = jnp.maximum(m_prev, jnp.max(s, axis=-1, keepdims=True))
        alpha = jnp.exp(m_prev - m_new)
        p = jnp.exp(s - m_new)
        l_sc[...] = alpha * l_sc[...] + jnp.sum(p, axis=-1, keepdims=True)
        acc_sc[...] = alpha * acc_sc[...] + jnp.dot(
            p.astype(v.dtype), v, preferred_element_type=jnp.float32)
        m_sc[...] = m_new

    if causal:
        # Skip kv blocks entirely above the diagonal.
        pl.when(ki * blk_k <= qi * blk_q + (blk_q - 1))(compute)
    else:
        compute()

    @pl.when(ki == pl.num_programs(2) - 1)
    def _():
        # Exact divide (not pl.reciprocal approx) for closer reference parity.
        o_ref[0] = (acc_sc[...] / l_sc[...]).astype(o_ref.dtype)


def moe_res_ln_kernel(flags_ref, x_ref, w1_ref, b1_ref, w2_ref, b2_ref, g_ref,
                      gamma_ref, beta_ref, o_ref, acc_ref):
    # Grid = (row_tiles, experts, h_tiles).  Experts/H are reduction axes into
    # a resident (tm, D) f32 accumulator; residual + LayerNorm epilogue fires
    # on the last (expert, h) step.  flags_ref (SMEM, scalar-prefetched) marks
    # whether any token in this row tile routed to this expert; skipped experts
    # have gate == 0 exactly, so skipping both dots (and the bias) is exact.
    r = pl.program_id(0)
    e = pl.program_id(1)
    hc = pl.program_id(2)
    n_e = pl.num_programs(1)
    n_h = pl.num_programs(2)

    @pl.when(jnp.logical_and(e == 0, hc == 0))
    def _():
        acc_ref[...] = jnp.zeros_like(acc_ref)

    @pl.when(flags_ref[r, e] > 0)
    def _():
        x = x_ref[...].astype(jnp.bfloat16)                            # (tm, D)
        h = jnp.dot(x, w1_ref[0], preferred_element_type=jnp.float32) + b1_ref[0]
        h = jnp.maximum(h, 0.0)                                        # (tm, th)
        y = jnp.dot(h.astype(jnp.bfloat16), w2_ref[0],
                    preferred_element_type=jnp.float32)                # (tm, D)
        # Expert output bias is added exactly once (last H chunk).
        last_h = (hc == n_h - 1).astype(jnp.float32)
        acc_ref[...] += g_ref[0] * (y + last_h * b2_ref[0])

    @pl.when(jnp.logical_and(e == n_e - 1, hc == n_h - 1))
    def _():
        hh = acc_ref[...] + x_ref[...]            # residual is the f32 input
        mu = jnp.mean(hh, axis=-1, keepdims=True)
        var = jnp.mean((hh - mu) ** 2, axis=-1, keepdims=True)
        hhat = (hh - mu) * lax.rsqrt(var + 1e-5)
        o_ref[...] = (hhat * gamma_ref[...] + beta_ref[...]).astype(o_ref.dtype)


# ----------------------------------------------------------------------------
# Pallas wrappers
# ----------------------------------------------------------------------------
def _to_bf16(x):
    return x if x.dtype == jnp.bfloat16 else x.astype(jnp.bfloat16)


def matmul_bias(x, w, b, *, tm=None, tn=None, tk=None, out_dtype=None):
    n, din = x.shape
    dout = w.shape[1]
    out_dtype = out_dtype or x.dtype
    x = _to_bf16(x)
    w = _to_bf16(w)
    b = b.astype(jnp.float32).reshape(1, dout)
    tm = _pick_tile(n, tm or _DEF_TM, (8,))
    tn = _pick_tile(dout, tn or _DEF_TN, (256, 128))
    tk = _pick_tile(din, tk or _DEF_TK, (256, 128))
    grid = (n // tm, dout // tn, din // tk)
    return pl.pallas_call(
        matmul_bias_kernel,
        out_shape=jax.ShapeDtypeStruct((n, dout), out_dtype),
        grid=grid,
        in_specs=[
            pl.BlockSpec((tm, tk), lambda i, j, k: (i, k)),
            pl.BlockSpec((tk, tn), lambda i, j, k: (k, j)),
            pl.BlockSpec((1, tn), lambda i, j, k: (0, j)),
        ],
        out_specs=pl.BlockSpec((tm, tn), lambda i, j, k: (i, j)),
        scratch_shapes=[pltpu.VMEM((tm, tn), jnp.float32)],
        compiler_params=pltpu.CompilerParams(
            dimension_semantics=("parallel", "parallel", "arbitrary"),
            vmem_limit_bytes=_VMEM_LIMIT),
    )(x, w, b)


def matmul_res_ln(x, w, b, resid, gamma, beta, *, tm=None, tk=None):
    # Fused o-projection + residual add + LayerNorm (output width = full dim).
    n, din = x.shape
    dout = w.shape[1]
    x = _to_bf16(x)
    w = _to_bf16(w)
    tm = _pick_tile(n, tm or _DEF_TM, (8,))
    tk = _pick_tile(din, tk or _DEF_TK, (256, 128))
    grid = (n // tm, din // tk)
    return pl.pallas_call(
        matmul_res_ln_kernel,
        out_shape=jax.ShapeDtypeStruct((n, dout), jnp.float32),
        grid=grid,
        in_specs=[
            pl.BlockSpec((tm, tk), lambda i, k: (i, k)),
            pl.BlockSpec((tk, dout), lambda i, k: (k, 0)),
            pl.BlockSpec((1, dout), lambda i, k: (0, 0)),
            pl.BlockSpec((tm, dout), lambda i, k: (i, 0)),
            pl.BlockSpec((1, dout), lambda i, k: (0, 0)),
            pl.BlockSpec((1, dout), lambda i, k: (0, 0)),
        ],
        out_specs=pl.BlockSpec((tm, dout), lambda i, k: (i, 0)),
        scratch_shapes=[pltpu.VMEM((tm, dout), jnp.float32)],
        compiler_params=pltpu.CompilerParams(
            dimension_semantics=("parallel", "arbitrary"),
            vmem_limit_bytes=_VMEM_LIMIT),
    )(x, w, b.astype(jnp.float32).reshape(1, dout), resid.astype(jnp.float32),
      gamma.reshape(1, dout), beta.reshape(1, dout))


def pallas_flash_attention(q, k, v, *, causal, blk_q=None, blk_k=None):
    # q/k/v: (B*H, T, dh) bf16.  Output (B*H, Tq, dh) in q.dtype.
    bh, tq_full, dh = q.shape
    tk_full = k.shape[1]
    scale = 1.0 / math.sqrt(dh)
    blk_q = _pick_tile(tq_full, blk_q or _DEF_TQ, (8,))
    blk_k = _pick_tile(tk_full, blk_k or _DEF_TKV, (8,))
    grid = (bh, tq_full // blk_q, tk_full // blk_k)
    kern = functools.partial(flash_attn_kernel, scale=scale, causal=causal,
                             blk_q=blk_q, blk_k=blk_k)
    return pl.pallas_call(
        kern,
        out_shape=jax.ShapeDtypeStruct((bh, tq_full, dh), q.dtype),
        grid=grid,
        in_specs=[
            pl.BlockSpec((1, blk_q, dh), lambda h, i, j: (h, i, 0)),
            pl.BlockSpec((1, blk_k, dh), lambda h, i, j: (h, j, 0)),
            pl.BlockSpec((1, blk_k, dh), lambda h, i, j: (h, j, 0)),
        ],
        out_specs=pl.BlockSpec((1, blk_q, dh), lambda h, i, j: (h, i, 0)),
        scratch_shapes=[
            pltpu.VMEM((blk_q, 1), jnp.float32),
            pltpu.VMEM((blk_q, 1), jnp.float32),
            pltpu.VMEM((blk_q, dh), jnp.float32),
        ],
        compiler_params=pltpu.CompilerParams(
            dimension_semantics=("parallel", "parallel", "arbitrary"),
            vmem_limit_bytes=_VMEM_LIMIT),
    )(q, k, v)


def moe_res_ln(x, w1, b1, w2, b2, gates, gamma, beta, *, tm=None, th=None):
    # x: (N, D) f32; w1: (E, D, H) bf16; b1: (E, H); w2: (E, H, D) bf16;
    # b2: (E, D); gates: (N, E) f32 with exact zeros off the top-k.
    n, d = x.shape
    e_num, _, hdim = w1.shape
    tm = _pick_tile(n, tm or _DEF_TM, (8,))
    th = _pick_tile(hdim, th or _DEF_TN, (256, 128))
    r_tiles = n // tm
    h_tiles = hdim // th
    # Per-(row-tile, expert) dispatch flags, scalar-prefetched into SMEM.
    flags = (gates > 0).reshape(r_tiles, tm, e_num).any(axis=1).astype(jnp.int32)
    gates_t = jnp.transpose(gates)[:, :, None]               # (E, N, 1)
    grid_spec = pltpu.PrefetchScalarGridSpec(
        num_scalar_prefetch=1,
        grid=(r_tiles, e_num, h_tiles),
        in_specs=[
            pl.BlockSpec((tm, d), lambda r, e, h, fl: (r, 0)),
            pl.BlockSpec((1, d, th), lambda r, e, h, fl: (e, 0, h)),
            pl.BlockSpec((1, 1, th), lambda r, e, h, fl: (e, 0, h)),
            pl.BlockSpec((1, th, d), lambda r, e, h, fl: (e, h, 0)),
            pl.BlockSpec((1, 1, d), lambda r, e, h, fl: (e, 0, 0)),
            pl.BlockSpec((1, tm, 1), lambda r, e, h, fl: (e, r, 0)),
            pl.BlockSpec((1, d), lambda r, e, h, fl: (0, 0)),
            pl.BlockSpec((1, d), lambda r, e, h, fl: (0, 0)),
        ],
        out_specs=pl.BlockSpec((tm, d), lambda r, e, h, fl: (r, 0)),
        scratch_shapes=[pltpu.VMEM((tm, d), jnp.float32)],
    )
    return pl.pallas_call(
        moe_res_ln_kernel,
        out_shape=jax.ShapeDtypeStruct((n, d), jnp.float32),
        grid_spec=grid_spec,
        compiler_params=pltpu.CompilerParams(
            dimension_semantics=("parallel", "arbitrary", "arbitrary"),
            vmem_limit_bytes=_VMEM_LIMIT),
    )(flags, x.astype(jnp.float32), w1,
      b1.astype(jnp.float32).reshape(e_num, 1, hdim), w2,
      b2.astype(jnp.float32).reshape(e_num, 1, d), gates_t,
      gamma.reshape(1, d), beta.reshape(1, d))


# ----------------------------------------------------------------------------
# Head split/merge helpers (layout plumbing in plain JAX)
# ----------------------------------------------------------------------------
def _split_heads(x, n_heads):
    bsz, t, d = x.shape
    dh = d // n_heads
    return (x.reshape(bsz, t, n_heads, dh)
             .transpose(0, 2, 1, 3)
             .reshape(bsz * n_heads, t, dh))


def _merge_heads(x, bsz, n_heads):
    _, t, dh = x.shape
    return (x.reshape(bsz, n_heads, t, dh)
             .transpose(0, 2, 1, 3)
             .reshape(bsz, t, n_heads * dh))


# ----------------------------------------------------------------------------
# Module-level forward (routing/top-k glue in plain JAX, hot paths in Pallas)
# ----------------------------------------------------------------------------
def decoder_forward(params, decoder_input_ids, enc_out, *, n_heads, top_k):
    b, t = decoder_input_ids.shape
    d = params["embed"].shape[1]
    tok_emb = jnp.take(params["embed"], decoder_input_ids, axis=0)   # (B, T, D)
    pos_emb = params["pos_embed"][:t]                                # (T, D)
    y = tok_emb + pos_emb                                            # dropout = identity (eval)

    n = b * t
    t_enc = enc_out.shape[1]
    enc_flat = enc_out.reshape(b * t_enc, d).astype(jnp.bfloat16)

    lb_loss = jnp.float32(0.0)
    next_kvs = []                                                    # use_cache=False
    yf = y.reshape(n, d).astype(jnp.float32)

    for lp in params["layers"]:
        # ---- self-attention (causal) + o-proj + residual + LN1 -------------
        sp = lp["self_attn"]
        qkv = matmul_bias(yf, sp["w_qkv"], sp["b_qkv"],
                          out_dtype=jnp.bfloat16).reshape(b, t, 3 * d)
        q, k, v = qkv[..., :d], qkv[..., d:2 * d], qkv[..., 2 * d:]
        sa = pallas_flash_attention(_split_heads(q, n_heads),
                                    _split_heads(k, n_heads),
                                    _split_heads(v, n_heads), causal=True)
        sa = _merge_heads(sa, b, n_heads).reshape(n, d)
        yf = matmul_res_ln(sa, sp["wo"], sp["bo"], yf, lp["ln1_g"], lp["ln1_b"])

        # ---- cross-attention + o-proj + residual + LN2 ---------------------
        cp = lp["cross_attn"]
        q = matmul_bias(yf, cp["wq"], cp["bq"],
                        out_dtype=jnp.bfloat16).reshape(b, t, d)
        kv = matmul_bias(enc_flat, cp["w_kv"], cp["b_kv"],
                         out_dtype=jnp.bfloat16).reshape(b, t_enc, 2 * d)
        ek, ev = kv[..., :d], kv[..., d:]
        ca = pallas_flash_attention(_split_heads(q, n_heads),
                                    _split_heads(ek, n_heads),
                                    _split_heads(ev, n_heads), causal=False)
        ca = _merge_heads(ca, b, n_heads).reshape(n, d)
        yf = matmul_res_ln(ca, cp["wo"], cp["bo"], yf, lp["ln2_g"], lp["ln2_b"])

        # ---- sparse MoE + residual + LN3 ------------------------------------
        mp = lp["moe"]
        e_num = mp["wg"].shape[1]
        pe = ((e_num + 127) // 128) * 128              # lane-dense router output
        wg_p = jnp.pad(mp["wg"], ((0, 0), (0, pe - e_num)))
        bg_p = jnp.pad(mp["bg"], (0, pe - e_num))
        logits = matmul_bias(yf, wg_p, bg_p, out_dtype=jnp.float32)[:, :e_num]
        probs = jax.nn.softmax(logits, axis=-1)
        topv, topi = lax.top_k(probs, top_k)
        topv = topv / jnp.sum(topv, axis=-1, keepdims=True)
        gates = jnp.zeros((n, e_num), jnp.float32)
        gates = gates.at[jnp.arange(n)[:, None], topi].set(topv)   # exact zeros off top-k
        yf = moe_res_ln(yf, mp["w1"], mp["b1"], mp["w2"], mp["b2"],
                        gates, lp["ln3_g"], lp["ln3_b"])

        # Switch-style load-balance loss.
        dispatch = (gates > 0).astype(jnp.float32)
        frac = jnp.mean(dispatch, axis=0)
        prob = jnp.mean(probs, axis=0)
        lb_loss = lb_loss + e_num * jnp.sum(frac * prob)

    return yf.reshape(b, t, d), lb_loss, next_kvs


# ----------------------------------------------------------------------------
# Deterministic parameter init (matmul weights stored in bf16, rest in f32)
# ----------------------------------------------------------------------------
def init_params(key, *, vocab, block_size, dim, n_layers, n_heads, n_experts):
    def nrm(k, shape, scale=0.02):
        return (scale * jax.random.normal(k, shape)).astype(jnp.float32)

    def w(k, shape):
        return nrm(k, shape).astype(jnp.bfloat16)

    keys = jax.random.split(key, 2 + n_layers)
    params = {
        "embed": nrm(keys[0], (vocab, dim)),
        "pos_embed": nrm(keys[1], (block_size, dim)),
        "layers": [],
    }
    hidden = 4 * dim
    for li in range(n_layers):
        lk = jax.random.split(keys[2 + li], 16)

        def attn_params(ks):
            wq = w(ks[0], (dim, dim))
            wk = w(ks[1], (dim, dim))
            wv = w(ks[2], (dim, dim))
            return {
                # fused projections (equivalent to separate q/k/v Linears)
                "w_qkv": jnp.concatenate([wq, wk, wv], axis=1),   # (D, 3D)
                "b_qkv": jnp.zeros((3 * dim,), jnp.float32),
                "wq": wq, "bq": jnp.zeros((dim,), jnp.float32),
                "w_kv": jnp.concatenate([wk, wv], axis=1),        # (D, 2D)
                "b_kv": jnp.zeros((2 * dim,), jnp.float32),
                "wo": w(ks[3], (dim, dim)), "bo": jnp.zeros((dim,), jnp.float32),
            }

        layer = {
            "self_attn": attn_params(lk[0:4]),
            "cross_attn": attn_params(lk[4:8]),
            "ln1_g": jnp.ones((dim,), jnp.float32), "ln1_b": jnp.zeros((dim,), jnp.float32),
            "ln2_g": jnp.ones((dim,), jnp.float32), "ln2_b": jnp.zeros((dim,), jnp.float32),
            "ln3_g": jnp.ones((dim,), jnp.float32), "ln3_b": jnp.zeros((dim,), jnp.float32),
            "moe": {
                "wg": w(lk[8], (dim, n_experts)),
                "bg": jnp.zeros((n_experts,), jnp.float32),
                "w1": w(lk[9], (n_experts, dim, hidden)),
                "b1": jnp.zeros((n_experts, hidden), jnp.float32),
                "w2": w(lk[10], (n_experts, hidden, dim)),
                "b2": jnp.zeros((n_experts, dim), jnp.float32),
            },
        }
        params["layers"].append(layer)
    return params


# ----------------------------------------------------------------------------
if __name__ == "__main__":
    # Small config consistent with the module's __init__.
    vocab_size = 64
    block_size = 16
    embed_dim = 32
    n_layers = 2
    n_heads = 4
    n_experts = 4
    top_k_experts = 2
    B, T = 2, 8

    root = jax.random.PRNGKey(0)
    kp, kid, kenc = jax.random.split(root, 3)
    params = init_params(
        kp, vocab=vocab_size, block_size=block_size, dim=embed_dim,
        n_layers=n_layers, n_heads=n_heads, n_experts=n_experts,
    )
    decoder_input_ids = jax.random.randint(kid, (B, T), 0, vocab_size)
    enc_out = jax.random.normal(kenc, (B, T, embed_dim), dtype=jnp.float32)

    y, lb_loss, next_kvs = decoder_forward(
        params, decoder_input_ids, enc_out, n_heads=n_heads, top_k=top_k_experts
    )
    jax.block_until_ready((y, lb_loss))
    assert y.shape == (B, T, embed_dim)
    print("KERNEL_OK")
</pallas_src>

<mosaic_0001>
module attributes {stable_mosaic.version = 11 : i64} {
  func.func @matmul_bias_kernel(%arg0: i32, %arg1: i32, %arg2: i32, %arg3: memref<16x32xbf16, #tpu.memory_space<vmem>>, %arg4: memref<32x96xbf16, #tpu.memory_space<vmem>>, %arg5: memref<1x96xf32, #tpu.memory_space<vmem>>, %arg6: memref<16x96xbf16, #tpu.memory_space<vmem>>, %arg7: memref<16x96xf32, #tpu.memory_space<vmem>>) attributes {dimension_semantics = [#tpu.dimension_semantics<parallel>, #tpu.dimension_semantics<parallel>, #tpu.dimension_semantics<arbitrary>], iteration_bounds = array<i64: 1, 1, 1>, scalar_prefetch = 0 : i64, scratch_operands = 1 : i64, tpu.core_type = #tpu.core_type<tc>, window_params = [{transform_indices = @transform_0, window_bounds = array<i64: 16, 32>}, {transform_indices = @transform_1, window_bounds = array<i64: 32, 96>}, {transform_indices = @transform_2, window_bounds = array<i64: 1, 96>}, {transform_indices = @transform_3, window_bounds = array<i64: 16, 96>}]} {
    %c0_i32 = arith.constant 0 : i32
    %0 = arith.cmpi eq, %arg2, %c0_i32 : i32
    %1 = arith.extui %0 : i1 to i32
    %c0_i32_0 = arith.constant 0 : i32
    %2 = arith.cmpi ne, %1, %c0_i32_0 : i32
    scf.if %2 {
      %cst_10 = arith.constant 0.000000e+00 : f32
      %12 = vector.broadcast %cst_10 : f32 to vector<16x96xf32>
      %c0_11 = arith.constant 0 : index
      %c0_12 = arith.constant 0 : index
      %13 = vector.load %arg7[%c0_11, %c0_12] : memref<16x96xf32, #tpu.memory_space<vmem>>, vector<16x96xf32>
      tpu.vector_store %arg7[%c0_11, %c0_12], %12 {strides = array<i32>} : memref<16x96xf32, #tpu.memory_space<vmem>>, vector<16x96xf32>,
    } else {
    }
    %c0 = arith.constant 0 : index
    %c0_1 = arith.constant 0 : index
    %3 = vector.load %arg7[%c0, %c0_1] : memref<16x96xf32, #tpu.memory_space<vmem>>, vector<16x96xf32>
    %c0_2 = arith.constant 0 : index
    %c0_3 = arith.constant 0 : index
    %4 = vector.load %arg3[%c0_2, %c0_3] : memref<16x32xbf16, #tpu.memory_space<vmem>>, vector<16x32xbf16>
    %c0_4 = arith.constant 0 : index
    %c0_5 = arith.constant 0 : index
    %5 = vector.load %arg4[%c0_4, %c0_5] : memref<32x96xbf16, #tpu.memory_space<vmem>>, vector<32x96xbf16>
    %cst = arith.constant dense<0.000000e+00> : vector<16x96xf32>
    %6 = tpu.matmul %4, %5, %cst {dimension_numbers = #tpu.dot_dimension_numbers<[1], [0], [0], [1], [0, 0, 1, 1], [], []>} : vector<16x32xbf16>, vector<32x96xbf16>, vector<16x96xf32> -> vector<16x96xf32>
    %7 = arith.addf %3, %6 : vector<16x96xf32>
    %c0_6 = arith.constant 0 : index
    %c0_7 = arith.constant 0 : index
    %8 = vector.load %arg7[%c0_6, %c0_7] : memref<16x96xf32, #tpu.memory_space<vmem>>, vector<16x96xf32>
    tpu.vector_store %arg7[%c0_6, %c0_7], %7 {strides = array<i32>} : memref<16x96xf32, #tpu.memory_space<vmem>>, vector<16x96xf32>,
    %c0_i32_8 = arith.constant 0 : i32
    %9 = arith.cmpi eq, %arg2, %c0_i32_8 : i32
    %10 = arith.extui %9 : i1 to i32
    %c0_i32_9 = arith.constant 0 : i32
    %11 = arith.cmpi ne, %10, %c0_i32_9 : i32
    scf.if %11 {
      %c0_10 = arith.constant 0 : index
      %c0_11 = arith.constant 0 : index
      %12 = vector.load %arg7[%c0_10, %c0_11] : memref<16x96xf32, #tpu.memory_space<vmem>>, vector<16x96xf32>
      %c0_12 = arith.constant 0 : index
      %c0_13 = arith.constant 0 : index
      %13 = vector.load %arg5[%c0_12, %c0_13] : memref<1x96xf32, #tpu.memory_space<vmem>>, vector<1x96xf32>
      %14 = vector.broadcast %13 : vector<1x96xf32> to vector<16x96xf32>
      %15 = arith.addf %12, %14 : vector<16x96xf32>
      %16 = arith.truncf %15 : vector<16x96xf32> to vector<16x96xbf16>
      %c0_14 = arith.constant 0 : index
      %c0_15 = arith.constant 0 : index
      %17 = vector.load %arg6[%c0_14, %c0_15] : memref<16x96xbf16, #tpu.memory_space<vmem>>, vector<16x96xbf16>
      tpu.vector_store %arg6[%c0_14, %c0_15], %16 {strides = array<i32>} : memref<16x96xbf16, #tpu.memory_space<vmem>>, vector<16x96xbf16>,
    } else {
    }
    return
  }
  func.func @transform_0(%arg0: i32, %arg1: i32, %arg2: i32) -> (i32, i32) {
    %c0_i32 = arith.constant 0 : i32
    return %arg0, %arg2 : i32, i32
  }
  func.func @transform_1(%arg0: i32, %arg1: i32, %arg2: i32) -> (i32, i32) {
    %c0_i32 = arith.constant 0 : i32
    return %arg2, %arg1 : i32, i32
  }
  func.func @transform_2(%arg0: i32, %arg1: i32, %arg2: i32) -> (i32, i32) {
    %c0_i32 = arith.constant 0 : i32
    %c0_i32_0 = arith.constant 0 : i32
    return %c0_i32, %arg1 : i32, i32
  }
  func.func @transform_3(%arg0: i32, %arg1: i32, %arg2: i32) -> (i32, i32) {
    %c0_i32 = arith.constant 0 : i32
    return %arg0, %arg1 : i32, i32
  }
}

</mosaic_0001>

<bundles_post_ra>
// kernel: tpu_custom_call.1
= control target key start
LH: loop header
LB: loop body
LE: loop exit
PB: predicated region body
PF: predicated region fallthrough
CT: control target
= control target key end

     0   :  { %8 = vsyncpa [#allocation4], 0  ;;  %s350_s0 = inlined_call_operand.hbm [shape: bf16[16,32], index: 0, kind: input, shape index: {}]   ;;  %s351_s1 = inlined_call_operand.hbm [shape: bf16[32,96], index: 1, kind: input, shape index: {}]   ;;  %s352_s2 = inlined_call_operand.vmem [shape: f32[1,96], index: 2, kind: input, shape index: {}]   ;;  %s353_s3 = inlined_call_operand.hbm [shape: bf16[16,96], index: 3, kind: output, shape index: {}]  }
   0x1   :  { %9 = vsyncpa [#allocation7], 0 }
   0x2   :  { %10 = vsyncpa [#allocation5], 0  ;;  %s271_s12 = smov [#allocation3]   ;;  %s199_s16 = scalar_lea.hbm %s350_s0, 128 }
   0x3   :  { %s16_s13 = sshll.u32 %s271_s12, 4  ;;  %p200_p0 = scmp.ne.s32.totalorder %s350_s0, %s199_s16  ;;  %s17_s13 = int_to_ptr.vmem [resolvable:$true] %s16_s13 }
   0x4   :  { %p203_p1 = scmp.lt.u32.totalorder %s199_s16, %s350_s0 }
   0x6   :  { %p205_p2 = pnand %p203_p1, %p200_p0 }
   0x8   :  { %208 = shalt.err (!%p205_p2)
}
   0x9   :  { %s209_s21 = scalar_lea.vmem %s17_s13, 128  ;;  %p214_p4 = scmp.lt.s32.totalorder %s17_s13, %s17_s13 }
   0xa   :  { %p210_p3 = scmp.ne.s32.totalorder %s17_s13, %s209_s21  ;;  %p215_p5 = scmp.lt.s32.totalorder %s209_s21, %s209_s21 }
   0xc   :  { %p216_p6 = por %p215_p5, %p214_p4 }
   0xe   :  { %p217_p7 = pnand %p216_p6, %p210_p3 }
  0x10   :  { %220 = shalt.err (!%p217_p7)
}
  0x11   :  { %s272_s22 = smov 64   ;;  %s273_s23 = smov 4  }
  0x12   :  { %22 = dma.hbm_to_vmem [thread:$0]  %s350_s0, 128, %s17_s13, [#allocation4], %s272_s22, %s272_s22, %s273_s23  }
  0x13   :  { %s274_s26 = smov [#allocation6]   ;;  %s221_s30 = scalar_lea.hbm %s351_s1, 256 }
  0x14   :  { %s28_s27 = sshll.u32 %s274_s26, 4  ;;  %p222_p8 = scmp.ne.s32.totalorder %s351_s1, %s221_s30  ;;  %s29_s27 = int_to_ptr.vmem [resolvable:$true] %s28_s27 }
  0x15   :  { %p225_p9 = scmp.lt.u32.totalorder %s221_s30, %s351_s1 }
  0x17   :  { %p227_p10 = pnand %p225_p9, %p222_p8 }
  0x19   :  { %230 = shalt.err (!%p227_p10)
}
  0x1a   :  { %s231_s8 = scalar_lea.vmem %s29_s27, 256  ;;  %p236_p12 = scmp.lt.s32.totalorder %s29_s27, %s29_s27 }
  0x1b   :  { %p232_p11 = scmp.ne.s32.totalorder %s29_s27, %s231_s8  ;;  %p237_p13 = scmp.lt.s32.totalorder %s231_s8, %s231_s8 }
  0x1d   :  { %p238_p0 = por %p237_p13, %p236_p12 }
  0x1f   :  { %p239_p1 = pnand %p238_p0, %p232_p11 }
  0x21   :  { %242 = shalt.err (!%p239_p1)
}
  0x22   :  { %34 = dma.hbm_to_vmem [thread:$0]  %s351_s1, 256, %s29_s27, [#allocation7], %s272_s22, %s272_s22, %s273_s23  }
  0x23   :  { %265 = dma.done.wait [#allocation4], 128  }
  0x24   :  { %266 = vsyncadd [#allocation4], 4294967168 }
  0x25   :  { %267 = dma.done.wait [#allocation7], 256  }
  0x26   :  { %268 = vsyncadd [#allocation7], 4294967040  ;;  %vm48_vm0 = vcmask 785408   ;;  %v275_v0 = vmov 0.0   ;;  %vm276_vm1 = vmmov 0   ;;  %v196_v1 = vld [vmem:[#allocation6] sm:$0xff]  }
  0x27   :  { %49 = vst.msk [vmem:[#allocation2] sm:$0xff] %vm48_vm0, %v275_v0  ;;  %50 = vst.msk [vmem:[#allocation2 + $0x8] sm:$0xff] %vm48_vm0, %v275_v0  ;;  %181 = vmatprep.subr.bf16.mxu0 %v275_v0  ;;  %185 = vmatprep.mubr.msk.bf16.mxu0 %vm276_vm1, %v275_v0  ;;  %v197_v2 = vld [vmem:[#allocation6 + $0x8] sm:$0xff]   ;;  %v198_v3 = vld [vmem:[#allocation3] sm:$0xff]   ;;  %vm76_vm2 = vcmask 261120   ;;  %vm148_vm3 = vcmask 781312  }
  0x28   :  { %182 = vmatpush3.bf16.msra.mxu0 %v196_v1  ;;  %v173_v12 = vld [vmem:[%s352_s2] ss:$0 sm:$0xff]  ;;  %s277_s11 = smov [#allocation8]  }
  0x29   :  { %183 = vmatprep.subr.bf16.mxu0 %v275_v0  ;;  %s156_s12 = sshll.u32 %s277_s11, 4  ;;  %s157_s12 = int_to_ptr.vmem [resolvable:$true] %s156_s12 }
  0x2a   :  { %s243_s13 = scalar_lea.vmem %s157_s12, 128  ;;  %p248_p3 = scmp.lt.s32.totalorder %s157_s12, %s157_s12 }
  0x2b   :  { %p244_p2 = scmp.ne.s32.totalorder %s157_s12, %s243_s13  ;;  %p249_p4 = scmp.lt.s32.totalorder %s243_s13, %s243_s13 }
  0x2c   :  { %184 = vmatpush3.bf16.msra.mxu0 %v197_v2 }
  0x2d   :  { %p250_p5 = por %p249_p4, %p248_p3 }
  0x2e   :  { %v51_v4 = vld [vmem:[#allocation2] sm:$0xff]  ;;  %v52_v6 = vld [vmem:[#allocation2 + $0x8] sm:$0xff] }
  0x2f   :  { %186 = vmatmul.mubr.msk.bf16.vlgmr.msra.gmra.mrb[0].mxu0 %vm76_vm2, %v198_v3  ;;  %p251_p6 = pnand %p250_p5, %p244_p2 }
 0x102   :  { %v114_v5 = vpop.f32.mrb[0].mxu0 }
 0x103   :  { %v121_v7 = vadd.f32 %v114_v5, %v51_v4  ;;  %v187_v8 = vpop.f32.mrb[1].mxu0 }
 0x104   :  { %v117_v9 = vpop.f32.mrb[2].mxu0 }
 0x105   :  { %124 = vst.msk [vmem:[#allocation2] sm:$0xff] %vm48_vm0, %v121_v7  ;;  %v122_v10 = vadd.f32 %v117_v9, %v52_v6  ;;  %v188_v11 = vpop.f32.mrb[3].mxu0 }
 0x107   :  { %125 = vst.msk [vmem:[#allocation2 + $0x8] sm:$0xff] %vm48_vm0, %v122_v10 }
 0x10c   :  { %v129_v13 = vld [vmem:[#allocation2] sm:$0xff] }
 0x10d   :  { %v138_v14 = vadd.f32 %v173_v12, %v129_v13 }
 0x10e   :  { %v130_v15 = vld [vmem:[#allocation2 + $0x8] sm:$0xff] }
 0x10f   :  { %v139_v16 = vadd.f32 %v173_v12, %v130_v15  ;;  %v176_v17 = vpack.c.bf16 %v138_v14, %v138_v14 }
 0x111   :  { %v177_v18 = vpack.c.bf16 %v139_v16, %v139_v16  ;;  %149 = vst.msk [vmem:[#allocation8] sm:$0xf] %vm148_vm3, %v176_v17 }
 0x113   :  { %150 = vst.msk [vmem:[#allocation8 + $0x4] sm:$0xf] %vm148_vm3, %v177_v18 }
 0x114   :  { %254 = shalt.err (!%p251_p6)
}
 0x115   :  { %s255_s15 = scalar_lea.hbm %s353_s3, 128 }
 0x116   :  { %p256_p7 = scmp.ne.s32.totalorder %s353_s3, %s255_s15  ;;  %p259_p8 = scmp.lt.u32.totalorder %s255_s15, %s353_s3 }
 0x118   :  { %p261_p9 = pnand %p259_p8, %p256_p7 }
 0x11a   :  { %264 = shalt.err (!%p261_p9)
}
 0x11b   :  { %162 = dma.vmem_to_hbm [thread:$0]  %s157_s12, 128, %s353_s3, [#allocation5], %s272_s22, %s272_s22, %s273_s23  }
 0x11c   :  { %269 = dma.done.wait [#allocation5], 128  }
 0x11d   :  { %270 = vsyncadd [#allocation5], 4294967168 }
 0x11e   :  { %166 = vsyncpa [#allocation4], 1 }
 0x11f   :  { %167 = vsyncpa [#allocation7], 1 }
 0x120   :  { %168 = vsyncpa [#allocation5], 1 }

</bundles_post_ra>
